<compile_context>
chip_gen: v7x
topology: tpu7x:2x2x1
jax: 0.10.0
libtpu: 0.0.40
codegen_flags: <defaults>
</compile_context>

<pallas_src>
import jax
import jax.numpy as jnp
from jax import lax
from jax.experimental import pallas as pl
from jax.experimental.pallas import tpu as pltpu


def _proj_kernel(x_ref, w_ref, b_ref, o_ref):
    # x_ref: (bt, K, TT)   w_ref: (K, E) f32   b_ref: (1, E) f32   o_ref: (bt, TT, E)
    w = w_ref[...]
    b = b_ref[...]
    # bt is a block-shape constant -> static (unrolled) loop over folded batch rows.
    for i in range(x_ref.shape[0]):
        x = x_ref[i].astype(jnp.float32)          # (K, TT); bf16 -> f32 upcast (VPU-cheap)
        # Contract the freq (sublane) axis: (K, TT)^T @ (K, E) -> (TT, E), f32 accumulate.
        acc = lax.dot_general(
            x, w,
            dimension_numbers=(((0,), (0,)), ((), ())),
            preferred_element_type=jnp.float32)
        o_ref[i] = (acc + b).astype(o_ref.dtype)


_VMEM_BUDGET = 12 * 1024 * 1024   # fits scoped-VMEM defaults on v5e/v6e/v7x w/o flags
_TT_TARGET = 4096                 # review: 2048-4096 time columns per step


def _step_bytes(bt, tt, n_freq, emb, x_bytes, out_bytes):
    """Per-grid-step VMEM estimate: double-buffered x/out tiles + in-kernel f32 scratch."""
    x_tile = bt * n_freq * tt * x_bytes
    out_tile = bt * tt * emb * out_bytes
    interm = 2 * bt * n_freq * tt * 4          # f32 upcast copy + MXU-relayout scratch
    return 2 * (x_tile + out_tile) + interm


def _choose_tiles(batch, n_freq, time, emb, x_bytes, out_bytes, resident_bytes):
    budget = _VMEM_BUDGET - resident_bytes
    # Time tile: full extent when short (always layout-legal), else the largest
    # 128-multiple that fits the budget.
    tt = time if time <= _TT_TARGET else (_TT_TARGET // 128) * 128
    while tt > 128 and _step_bytes(1, tt, n_freq, emb, x_bytes, out_bytes) > budget:
        tt = max(128, ((tt // 2) // 128) * 128)
    n_tt = pl.cdiv(time, tt)
    # Batch folding: only worthwhile when time fits in a single tile (per-step bytes
    # are already large otherwise).
    if n_tt > 1:
        bt = 1
    else:
        row = _step_bytes(1, tt, n_freq, emb, x_bytes, out_bytes)
        bt = int(max(1, min(batch, budget // max(row, 1))))
        if bt >= batch and batch > 1:
            bt = pl.cdiv(batch, 2)   # keep >=2 grid steps so v7x's two TCs both work
    return bt, tt


def patch_frequency_embedding(x, weight, bias, *, tile_t=None, tile_b=None):
    """
    x:      (batch, n_freq, time)   float32 or bfloat16 (prefer bf16 from the producer)
    weight: (emb_size, n_freq)      float32   (PyTorch nn.Linear convention)
    bias:   (emb_size,)             float32
    returns (batch, time, emb_size) float32
    """
    batch, n_freq, time = x.shape
    emb_size = weight.shape[0]
    out_dtype = jnp.float32                      # nn.Linear(f32) semantics

    w_t = weight.astype(jnp.float32).T           # (n_freq, emb) — tiny one-time transpose
    b2d = bias.astype(jnp.float32).reshape(1, emb_size)

    x_bytes = jnp.dtype(x.dtype).itemsize
    out_bytes = jnp.dtype(out_dtype).itemsize
    resident = (n_freq * emb_size + emb_size) * 4    # VMEM-resident weight + bias

    bt, tt = _choose_tiles(batch, n_freq, time, emb_size, x_bytes, out_bytes, resident)
    if tile_t is not None:
        tt = tile_t
    if tile_b is not None:
        bt = tile_b
    grid = (pl.cdiv(batch, bt), pl.cdiv(time, tt))

    cost = pl.CostEstimate(
        flops=2 * batch * time * n_freq * emb_size,
        transcendentals=0,
        bytes_accessed=(batch * n_freq * time * x_bytes
                        + resident
                        + batch * time * emb_size * out_bytes))

    out = pl.pallas_call(
        _proj_kernel,
        out_shape=jax.ShapeDtypeStruct((batch, time, emb_size), out_dtype),
        grid_spec=pltpu.PrefetchScalarGridSpec(
            num_scalar_prefetch=0,
            grid=grid,
            in_specs=[
                # x tile: bt batch rows, ALL freqs (never tile K!), tt time columns.
                pl.BlockSpec((bt, n_freq, tt), lambda b, t: (b, 0, t)),
                # Weight / bias: constant block index -> fetched once, VMEM-resident.
                pl.BlockSpec((n_freq, emb_size), lambda b, t: (0, 0)),
                pl.BlockSpec((1, emb_size), lambda b, t: (0, 0)),
            ],
            out_specs=pl.BlockSpec((bt, tt, emb_size), lambda b, t: (b, t, 0)),
        ),
        compiler_params=pltpu.CompilerParams(
            dimension_semantics=("parallel", "parallel")),
        cost_estimate=cost,
    )(x, w_t, b2d)
    return out


if __name__ == "__main__":
    key = jax.random.PRNGKey(0)

    def make_params(k, n_freq, emb):
        kw, kb = jax.random.split(k)
        bound = 1.0 / (n_freq ** 0.5)
        w = jax.random.uniform(kw, (emb, n_freq), jnp.float32, -bound, bound)
        b = jax.random.uniform(kb, (emb,), jnp.float32, -bound, bound)
        return w, b

    ok = True

    # (a) tiny f32 path: batch=2, n_freq=101, time=8, emb=32  (grid=(2,1), bt=1).
    k1, k2, key = jax.random.split(key, 3)
    B, K, T, E = 2, 101, 8, 32
    w, b = make_params(k1, K, E)
    x = jax.random.normal(k2, (B, K, T), jnp.float32)
    out = jax.block_until_ready(patch_frequency_embedding(x, w, b))
    ref = jnp.einsum("bft,ef->bte", x, w, precision=lax.Precision.HIGHEST) + b
    ok &= out.shape == (B, T, E)
    ok &= bool(jnp.allclose(out, ref, atol=2e-3, rtol=2e-3))

    # (b) bf16-producer path, exercises batch folding (bt=2) and module-default emb=256.
    k1, k2, key = jax.random.split(key, 3)
    B, K, T, E = 4, 101, 256, 256
    w, b = make_params(k1, K, E)
    x16 = jax.random.normal(k2, (B, K, T), jnp.float32).astype(jnp.bfloat16)
    out = jax.block_until_ready(patch_frequency_embedding(x16, w, b))
    ref = jnp.einsum("bft,ef->bte", x16.astype(jnp.float32), w,
                     precision=lax.Precision.HIGHEST) + b
    ok &= out.shape == (B, T, E)
    ok &= bool(jnp.allclose(out, ref, atol=2e-3, rtol=2e-3))

    assert ok
    print("KERNEL_OK")
</pallas_src>

<mosaic_0001>
module attributes {stable_mosaic.version = 11 : i64} {
  func.func @_proj_kernel(%arg0: i32, %arg1: i32, %arg2: memref<1x101x8xf32, #tpu.memory_space<vmem>>, %arg3: memref<101x32xf32, #tpu.memory_space<vmem>>, %arg4: memref<1x32xf32, #tpu.memory_space<vmem>>, %arg5: memref<1x8x32xf32, #tpu.memory_space<vmem>>) attributes {dimension_semantics = [#tpu.dimension_semantics<parallel>, #tpu.dimension_semantics<parallel>], iteration_bounds = array<i64: 2, 1>, scalar_prefetch = 0 : i64, scratch_operands = 0 : i64, tpu.core_type = #tpu.core_type<tc>, window_params = [{transform_indices = @transform_0, window_bounds = array<i64: 1, 101, 8>}, {pipeline_mode = #tpu.pipeline_mode<synchronous>, transform_indices = @transform_1, window_bounds = array<i64: 101, 32>}, {pipeline_mode = #tpu.pipeline_mode<synchronous>, transform_indices = @transform_2, window_bounds = array<i64: 1, 32>}, {transform_indices = @transform_3, window_bounds = array<i64: 1, 8, 32>}]} {
    %c0 = arith.constant 0 : index
    %c0_0 = arith.constant 0 : index
    %0 = vector.load %arg3[%c0, %c0_0] : memref<101x32xf32, #tpu.memory_space<vmem>>, vector<101x32xf32>
    %c0_1 = arith.constant 0 : index
    %c0_2 = arith.constant 0 : index
    %1 = vector.load %arg4[%c0_1, %c0_2] : memref<1x32xf32, #tpu.memory_space<vmem>>, vector<1x32xf32>
    %c0_3 = arith.constant 0 : index
    %c0_4 = arith.constant 0 : index
    %c0_5 = arith.constant 0 : index
    %2 = vector.load %arg2[%c0_3, %c0_4, %c0_5] : memref<1x101x8xf32, #tpu.memory_space<vmem>>, vector<1x101x8xf32>
    %3 = vector.shape_cast %2 : vector<1x101x8xf32> to vector<101x8xf32>
    %cst = arith.constant dense<0.000000e+00> : vector<8x32xf32>
    %4 = tpu.matmul %3, %0, %cst {dimension_numbers = #tpu.dot_dimension_numbers<[0], [0], [1], [1], [0, 1, 1, 1], [], []>} : vector<101x8xf32>, vector<101x32xf32>, vector<8x32xf32> -> vector<8x32xf32>
    %5 = vector.broadcast %1 : vector<1x32xf32> to vector<8x32xf32>
    %6 = arith.addf %4, %5 : vector<8x32xf32>
    %c0_6 = arith.constant 0 : index
    %c0_7 = arith.constant 0 : index
    %c0_8 = arith.constant 0 : index
    %7 = vector.load %arg5[%c0_6, %c0_7, %c0_8] : memref<1x8x32xf32, #tpu.memory_space<vmem>>, vector<1x8x32xf32>
    %8 = vector.shape_cast %7 : vector<1x8x32xf32> to vector<8x32xf32>
    %9 = vector.shape_cast %6 : vector<8x32xf32> to vector<1x8x32xf32>
    tpu.vector_store %arg5[%c0_6, %c0_7, %c0_8], %9 {strides = array<i32>} : memref<1x8x32xf32, #tpu.memory_space<vmem>>, vector<1x8x32xf32>,
    return
  }
  func.func @transform_0(%arg0: i32, %arg1: i32) -> (i32, i32, i32) {
    %c0_i32 = arith.constant 0 : i32
    %c0_i32_0 = arith.constant 0 : i32
    return %arg0, %c0_i32, %arg1 : i32, i32, i32
  }
  func.func @transform_1(%arg0: i32, %arg1: i32) -> (i32, i32) {
    %c0_i32 = arith.constant 0 : i32
    %c0_i32_0 = arith.constant 0 : i32
    %c0_i32_1 = arith.constant 0 : i32
    return %c0_i32, %c0_i32_0 : i32, i32
  }
  func.func @transform_2(%arg0: i32, %arg1: i32) -> (i32, i32) {
    %c0_i32 = arith.constant 0 : i32
    %c0_i32_0 = arith.constant 0 : i32
    %c0_i32_1 = arith.constant 0 : i32
    return %c0_i32, %c0_i32_0 : i32, i32
  }
  func.func @transform_3(%arg0: i32, %arg1: i32) -> (i32, i32, i32) {
    %c0_i32 = arith.constant 0 : i32
    %c0_i32_0 = arith.constant 0 : i32
    return %arg0, %arg1, %c0_i32 : i32, i32, i32
  }
}

</mosaic_0001>

<bundles_post_ra>
// kernel: tpu_custom_call.1
= control target key start
LH: loop header
LB: loop body
LE: loop exit
PB: predicated region body
PF: predicated region fallthrough
CT: control target
= control target key end

     0   :  { %8 = vsyncpa [#allocation3], 0  ;;  %s835_s0 = inlined_call_operand.vmem [shape: f32[2,101,8], index: 0, kind: input, shape index: {}]   ;;  %s836_s1 = inlined_call_operand.vmem [shape: f32[101,32], index: 1, kind: input, shape index: {}]   ;;  %s837_s2 = inlined_call_operand.vmem [shape: f32[1,32], index: 2, kind: input, shape index: {}]   ;;  %s838_s3 = inlined_call_operand.hbm [shape: f32[2,8,32], index: 3, kind: output, shape index: {}]  }
   0x1   :  { %10 = vsyncpa [#allocation3 + $0x1], 0  ;;  %s666_s12 = smov 0   ;;  %s668_s13 = smov 0  }
   0x2   :  { %s670_s14 = smov 0   ;;  %s672_s15 = smov 0  }
   0x3   :  { %s674_s16 = smov 0   ;;  %s676_s17 = smov 0  }
   0x4 LB: > { %s428_s18 = sadd.s32 4294967295, %s640_s17   ;;  %s429_s19 = sadd.s32 4294967294, %s640_s17   ;;  %s640_s17 = sphi %s676_s17, %s16_s17   ;;  %s636_s16 = sphi %s674_s16, %s845_s16   ;;  %s632_s15 = sphi %s672_s15, %s844_s15   ;;  %s628_s14 = sphi %s670_s14, %s843_s14   ;;  %s624_s13 = sphi %s668_s13, %s842_s13   ;;  %s620_s12 = sphi %s666_s12, %s841_s12  }
   0x5   : > { %s28_s20 = sadd.s32 1, %s636_s16  ;;  %s107_s21 = sadd.s32 1, %s628_s14 }
   0x6   : > { %p30_p0 = scmp.ge.s32.totalorder %s28_s20, 2  ;;  %p117_p1 = scmp.ne.s32.totalorder %s628_s14, %s624_s13 }
   0x7   : > { %p118_p2 = scmp.eq.s32.totalorder %s428_s18, 1  ;;  %p123_p3 = scmp.ne.s32.totalorder %s624_s13, %s620_s12 }
   0x8   : > { %s847_s20 = smov (%p30_p0, %s28_s20), 0  ;;  %p124_p5 = scmp.eq.s32.totalorder %s429_s19, 1 }
   0x9   : > { %p706_p4 = por %p118_p2, %p117_p1  ;;  %s102_s23 = ssub.s32 %s636_s16, %s847_s20 }
   0xa   : > { %p432_p6 = scmp.ge.s32.totalorder %s640_s17, 1  ;;  %p105_p7 = scmp.eq.s32.totalorder %s102_s23, 0 }
   0xb   : > { %p713_p8 = por %p124_p5, %p123_p3  ;;  %p159_p9 = scmp.lt.s32.totalorder %s640_s17, 3 }
   0xc   : > { %s719_s25 = scalar_select %p105_p7, %s628_s14, %s107_s21  }
   0xd   : > { %p160_p10 = pnand %p432_p6, %p159_p9 }
   0xe   : > { %p186_p11 = scmp.lt.s32.totalorder (!%p160_p10), %s632_s15, 1  ;;  %v194_v0 = vld [vmem:[%s836_s1] sm:$0xff] (!%p160_p10)  ;;  %v195_v1 = vld [vmem:[%s836_s1 + $0x8] sm:$0xff] (!%p160_p10)  ;;  %v196_v2 = vld [vmem:[%s836_s1 + $0x10] sm:$0xff] (!%p160_p10)  ;;  %v642_v3 = vmov (!%p160_p10), 0.0|0.0   ;;  %vm643_vm0 = vmmov (!%p160_p10), 0  }
   0xf   : > { %163 = sbr.rel (%p160_p10) target bundleno = 385 (0x181), region = 32  ;;  %485 = vmatprep.subr.bf16.mxu0 (!%p160_p10), %v642_v3  ;;  %v486_v4 = vpack.c.bf16 (!%p160_p10), %v195_v1, %v194_v0  ;;  %v197_v5 = vld [vmem:[%s836_s1 + $0x18] sm:$0xff] (!%p160_p10)  ;;  %v644_v6 = vmov (!%p160_p10), 0.0   ;;  %v198_v8 = vld [vmem:[%s836_s1 + $0x20] sm:$0xff] (!%p160_p10)  ;;  %v199_v9 = vld [vmem:[%s836_s1 + $0x28] sm:$0xff] (!%p160_p10)  ;;  %vm263_vm1 = vcmask (!%p160_p10), 1044480  }
  0x10   : > { %482 = vmatprep.mubr.msk.f32.mxu0 (!%p160_p10), %vm643_vm0, %v644_v6  ;;  %v489_v7 = vpack.c.bf16 (!%p160_p10), %v197_v5, %v196_v2  ;;  %v492_v11 = vpack.c.bf16 (!%p160_p10), %v199_v9, %v198_v8  ;;  %v200_v12 = vld [vmem:[%s836_s1 + $0x30] sm:$0xff] (!%p160_p10)  ;;  %v201_v13 = vld [vmem:[%s836_s1 + $0x38] sm:$0xff] (!%p160_p10)  ;;  %v202_v16 = vld [vmem:[%s836_s1 + $0x40] sm:$0xff] (!%p160_p10)  ;;  %vm259_vm2 = vcmask (!%p160_p10), 826368   ;;  %s183_s19 = sand.u32 (!%p160_p10), 1, %s624_s13   ;;  %s439_s28 = sshll.u32 (!%p160_p10), %s632_s15, 7 }
  0x11   : > { %487 = vmatpush3.bf16.msra.mxu0 (!%p160_p10), %v486_v4  ;;  %v495_v15 = vpack.c.bf16 (!%p160_p10), %v201_v13, %v200_v12  ;;  %v203_v17 = vld [vmem:[%s836_s1 + $0x48] sm:$0xff] (!%p160_p10)  ;;  %v204_v20 = vld [vmem:[%s836_s1 + $0x50] sm:$0xff] (!%p160_p10)  ;;  %v205_v21 = vld [vmem:[%s836_s1 + $0x58] sm:$0xff] (!%p160_p10)  ;;  %s433_s21 = sshll.u32 (!%p160_p10), %s183_s19, 3  ;;  %vm337_vm3 = vcmask (!%p160_p10), 261120   ;;  %s788_s5 = scalar_lea.hbm (!%p160_p10), %s838_s3, %s439_s28 }
  0x12   : > { %488 = vmatprep.subr.bf16.mxu0 (!%p160_p10), %v642_v3  ;;  %v498_v19 = vpack.c.bf16 (!%p160_p10), %v203_v17, %v202_v16  ;;  %v501_v23 = vpack.c.bf16 (!%p160_p10), %v205_v21, %v204_v20  ;;  %v206_v25 = vld [vmem:[%s836_s1 + $0x60] sm:$0x1f] (!%p160_p10)  ;;  %s185_s29 = scalar_lea.vmem (!%p160_p10), [#allocation2], %s433_s21  ;;  %s340_s6 = scalar_lea.sflag (!%p160_p10), [#allocation3], %s183_s19 }
  0x13   : > { %v435_v35 = vld [vmem:[%s837_s2] ss:$0 sm:$0xff] (!%p160_p10)  ;;  %s354_s30 = sshll.u32 (!%p160_p10), %s185_s29, 4  ;;  %s790_s30 = int_to_ptr.vmem [resolvable:$true] %s354_s30 }
  0x15   : > { %490 = vmatpush3.bf16.msra.mxu0 (!%p160_p10), %v489_v7 }
  0x16   : > { %s187_s7 = scalar_select %p186_p11, %s632_s15, 1  ;;  %491 = vmatprep.subr.bf16.mxu0 %v642_v3 }
  0x17   : > { %s645_s15 = smov [#allocation2]  }
  0x18   : > { %s503_s8 = smul.u32 104, %s187_s7  ;;  %s562_s7 = scalar_lea.vmem %s790_s30, 128 }
  0x19   : > { %493 = vmatpush3.bf16.msra.mxu0 %v492_v11  ;;  %p563_p12 = scmp.ne.s32.totalorder %s790_s30, %s562_s7 }
  0x1a   : > { %s744_s23 = scalar_lea.vmem %s835_s0, %s503_s8  ;;  %494 = vmatprep.subr.bf16.mxu0 %v642_v3  ;;  %s566_s8 = sshll.u32 %s645_s15, 4  ;;  %s567_s8 = int_to_ptr.vmem [resolvable:$false] %s566_s8 }
  0x1b   : > { %v208_v10 = vld [vmem:[%s744_s23] sm:$0xff]  ;;  %v209_v14 = vld [vmem:[%s744_s23 + $0x8] sm:$0xff]  ;;  %v210_v18 = vld [vmem:[%s744_s23 + $0x10] sm:$0xff]  ;;  %p564_p13 = pnand %p563_p12, %p706_p4  ;;  %s568_s9 = scalar_lea.vmem %s567_s8, 256 }
  0x1c   : > { %227 = vxpose.xlu0.b32.start [1/13] (short) (narrow) %v208_v10, 8  ;;  %v211_v22 = vld [vmem:[%s744_s23 + $0x18] sm:$0xff]  ;;  %v212_v24 = vld [vmem:[%s744_s23 + $0x20] sm:$0xff]  ;;  %v213_v26 = vld [vmem:[%s744_s23 + $0x28] sm:$0xff]  ;;  %p569_p1 = scmp.lt.s32.totalorder %s790_s30, %s567_s8  ;;  %p570_p2 = scmp.lt.s32.totalorder %s568_s9, %s562_s7 }
  0x1d   : > { %496 = vmatpush3.bf16.msra.mxu0 %v495_v15  ;;  %v214_v27 = vld [vmem:[%s744_s23 + $0x30] sm:$0xff]  ;;  %v215_v28 = vld [vmem:[%s744_s23 + $0x38] sm:$0xff]  ;;  %v216_v29 = vld [vmem:[%s744_s23 + $0x40] sm:$0xff]  ;;  %p565_p0 = pneg %p564_p13 }
  0x1e   : > { %497 = vmatprep.subr.bf16.mxu0 %v642_v3  ;;  %v217_v30 = vld [vmem:[%s744_s23 + $0x48] sm:$0xff]  ;;  %v218_v31 = vld [vmem:[%s744_s23 + $0x50] sm:$0xff]  ;;  %v219_v32 = vld [vmem:[%s744_s23 + $0x58] sm:$0xff]  ;;  %p571_p3 = por %p570_p2, %p569_p1 }
  0x1f   : > { %v220_v33 = vld [vmem:[%s744_s23 + $0x60] sm:$0x1f] }
  0x20   : > { %228 = vxpose.xlu0.b32.cont [2/13] (short) (narrow) %v209_v14, 8  ;;  %p572_p5 = pnand %p571_p3, %p565_p0 }
  0x21   : > { %499 = vmatpush3.bf16.msra.mxu0 %v498_v19 }
  0x22   : > { %500 = vmatprep.subr.bf16.mxu0 %v642_v3 }
  0x24   : > { %229 = vxpose.xlu0.b32.cont [3/13] (short) (narrow) %v210_v18, 8 }
  0x25   : > { %502 = vmatpush3.bf16.msra.mxu0 %v501_v23 }
  0x26   : > { %480 = vmatprep.subr.mxu0 %v644_v6 }
  0x28   : > { %230 = vxpose.xlu0.b32.cont [4/13] (short) (narrow) %v211_v22, 8 }
  0x29   : > { %481 = vmatpush3.msk.msra.mxu0 %vm263_vm1, %v206_v25 }
  0x2c   : > { %231 = vxpose.xlu0.b32.cont [5/13] (short) (narrow) %v212_v24, 8 }
  0x30   : > { %232 = vxpose.xlu0.b32.cont [6/13] (short) (narrow) %v213_v26, 8 }
  0x34   : > { %233 = vxpose.xlu0.b32.cont [7/13] (short) (narrow) %v214_v27, 8 }
  0x38   : > { %234 = vxpose.xlu0.b32.cont [8/13] (short) (narrow) %v215_v28, 8 }
  0x3c   : > { %235 = vxpose.xlu0.b32.cont [9/13] (short) (narrow) %v216_v29, 8 }
  0x40   : > { %236 = vxpose.xlu0.b32.cont [10/13] (short) (narrow) %v217_v30, 8 }
  0x44   : > { %237 = vxpose.xlu0.b32.cont [11/13] (short) (narrow) %v218_v31, 8 }
  0x48   : > { %238 = vxpose.xlu0.b32.cont [12/13] (short) (narrow) %v219_v32, 8 }
  0x4c   : > { %239 = vxpose.xlu0.b32.end [13/13] (short) (narrow) %v220_v33, 8 }
  0x9c   : > { %v243_v34 = vpop.trf.xlu0 }
  0x9d   : > { %483 = vmatmul.mubr.msk.f32.vlgmr.msra.gmra.mrb[0].mxu0 %vm259_vm2, %v243_v34 }
 0x170   : > { %v333_v36 = vpop.f32.mrb[0].mxu0 }
 0x171   : > { %v334_v37 = vadd.f32 %v435_v35, %v333_v36  ;;  %v484_v38 = vpop.f32.mrb[1].mxu0 }
 0x173   : > { %338 = vst.msk [vmem:[%s185_s29] sm:$0xff] %vm337_vm3, %v334_v37 }
 0x174   : > { %575 = shalt.err (!%p572_p5)
}
 0x175   : > { %s576_s10 = scalar_lea.hbm %s788_s5, 128  ;;  %s580_s19 = scalar_lea.hbm %s838_s3, 256 }
 0x176   : > { %p577_p6 = scmp.ne.s32.totalorder %s788_s5, %s576_s10  ;;  %p581_p10 = scmp.lt.u32.totalorder %s788_s5, %s838_s3 }
 0x177   : > { %p582_p11 = scmp.lt.u32.totalorder %s580_s19, %s576_s10  ;;  %p584_p13 = scmp.lt.u32.totalorder %s576_s10, %s788_s5 }
 0x178   : > { %p578_p7 = pnand %p577_p6, %p706_p4 }
 0x179   : > { %p583_p12 = por %p582_p11, %p581_p10 }
 0x17a   : > { %p579_p9 = pneg %p578_p7 }
 0x17b   : > { %p585_p0 = por %p584_p13, %p583_p12 }
 0x17d   : > { %p586_p1 = pnand %p585_p0, %p579_p9 }
 0x17f   : > { %589 = shalt.err (!%p586_p1)
}
 0x180   : > { %504 = dma.vmem_to_hbm [thread:$0]  (%p706_p4), %s790_s30, 128, %s788_s5, %s340_s6  }
 0x181 PF: > { %p510_p2 = scmp.ge.s32.totalorder %s640_s17, 2  ;;  %s366_s27 = sand.u32 1, %s620_s12  }
 0x182   : > { %s367_s28 = scalar_lea.sflag [#allocation3], %s366_s27 }
 0x183   : > { %p507_p3 = pnand %p510_p2, %p713_p8 }
 0x185   : > { %615 = dma.done.wait (!%p507_p3), %s367_s28, 128  }
 0x186   : > { %617 = vsyncadd (!%p507_p3), %s367_s28, 4294967168  ;;  %s16_s17 = sadd.s32 1, %s640_s17   ;;  %s841_s12 = smov %s624_s13 }
 0x187   : > { %p13_p5 = scmp.ge.s32.totalorder %s16_s17, 4   ;;  %s842_s13 = smov %s628_s14 }
 0x188   : > { %s843_s14 = smov %s719_s25  ;;  %s844_s15 = smov %s636_s16 }
 0x189   : > { %s845_s16 = smov %s847_s20  ;;  %15 = sbr.rel (!%p13_p5) target bundleno = 4 (0x4), region = 67 }
 0x190   :  { %372 = vsyncpa [#allocation3], 1 }
 0x191   :  { %374 = vsyncpa [#allocation3 + $0x1], 1 }

</bundles_post_ra>
